<compile_context>
chip_gen: v5e
topology: v5e:2x2
jax: 0.10.0
libtpu: 0.0.40
codegen_flags: <defaults>
</compile_context>

<pallas_src>
import functools

import jax
import jax.numpy as jnp
from jax.experimental import pallas as pl
from jax.experimental.pallas import tpu as pltpu

LANES = 128
SUBLANES = 8
TARGET_TILE_BYTES = 2 * 1024 * 1024   # ~2 MiB of input per grid step
NUM_CORE_SPLITS = 2                   # leading "parallel" grid axis (megacore on v7x)


def _gan_loss_kernel(pred_ref, out_ref, acc_ref, *, gan_mode, target, scale,
                     steps_per_core, block_rows, valid_elems, needs_mask):
    """Streaming reduction of the per-element GAN loss.

    Grid is (num_core_splits, steps_per_core). acc_ref is a per-core (8, 128)
    partial-sum buffer; each core writes its own (1, 1) partial at its last step.
    `target` and `scale` (= sign / n) are compile-time Python floats.
    """
    i = pl.program_id(1)                       # reduction step within this core

    @pl.when(i == 0)
    def _():
        acc_ref[...] = jnp.zeros_like(acc_ref)

    x = pred_ref[...].astype(jnp.float32)

    if gan_mode == 'lsgan':
        d = x - target
        f = d * d
    elif gan_mode == 'vanilla':
        # numerically-stable BCEWithLogits against a constant target
        f = jnp.maximum(x, 0.0) - x * target + jnp.log1p(jnp.exp(-jnp.abs(x)))
    else:  # 'wgangp'
        f = x

    def _accumulate(vals):
        # Sublane-axis split keeps this a pure VPU vreg add per step; cross-lane
        # reductions are deferred to the finalize below.
        vals = vals.reshape(block_rows // SUBLANES, SUBLANES, LANES)
        acc_ref[...] += jnp.sum(vals, axis=0)

    if needs_mask:
        block_elems = block_rows * LANES
        full_blocks = valid_elems // block_elems          # fully-valid blocks
        b = pl.program_id(0) * steps_per_core + i         # logical global block idx

        @pl.when(b < full_blocks)
        def _():
            _accumulate(f)

        @pl.when(b >= full_blocks)
        def _():
            row = jax.lax.broadcasted_iota(jnp.int32, (block_rows, LANES), 0)
            col = jax.lax.broadcasted_iota(jnp.int32, (block_rows, LANES), 1)
            idx = row * LANES + col
            limit = valid_elems - b * block_elems         # <= 0 for fully-padded blocks
            _accumulate(jnp.where(idx < limit, f, 0.0))
    else:
        _accumulate(f)

    @pl.when(i == pl.num_programs(1) - 1)
    def _():
        total = jnp.sum(acc_ref[...], axis=0, keepdims=True)   # (1, LANES)
        total = jnp.sum(total, axis=1, keepdims=True)          # (1, 1)
        out_ref[...] = total * scale


def gan_loss(prediction, target_is_real, gan_mode='lsgan',
             target_real_label=1.0, target_fake_label=0.0,
             block_rows=None, num_core_splits=NUM_CORE_SPLITS):
    """Pallas implementation of GANLoss.forward. Returns a float32 scalar.

    gan_mode / target_is_real must be Python (trace-time) values, matching the
    PyTorch module's `if` statements.
    """
    if gan_mode not in ('lsgan', 'vanilla', 'wgangp'):
        raise NotImplementedError(f'GAN mode {gan_mode} not implemented')

    n = int(prediction.size)
    target = float(target_real_label if target_is_real else target_fake_label)
    sign = 1.0
    if gan_mode == 'wgangp':
        sign = -1.0 if target_is_real else 1.0

    # Flatten to a lanes-last 2D slab. Reshape of a contiguous array is free; no
    # pad-to-tile-multiple copy any more (partial blocks are masked in-kernel).
    flat = prediction.reshape(-1)
    rows = pl.cdiv(n, LANES)
    rem = n % LANES
    if rem:
        # TODO(synk): rare ragged tail (< 128 elems); this pad copies the tensor once.
        flat = jnp.pad(flat, (0, LANES - rem))
    x2d = flat.reshape(rows, LANES)

    # Tile rows: ~2 MiB of input per grid step (amortizes ~0.35us step overhead;
    # double-buffered this stays far under every generation's scoped-VMEM default),
    # a multiple of 8 sublanes, and no larger than the rounded-up row count.
    itemsize = jnp.dtype(prediction.dtype).itemsize
    if block_rows is None:
        block_rows = max(SUBLANES, TARGET_TILE_BYTES // (LANES * itemsize))
    rows8 = ((rows + SUBLANES - 1) // SUBLANES) * SUBLANES
    tm = max(SUBLANES, min((int(block_rows) // SUBLANES) * SUBLANES, rows8))

    num_blocks = pl.cdiv(rows, tm)          # blocks actually covering the data
    nc = max(1, int(num_core_splits))       # leading "parallel" axis (2 TCs on v7x)
    spc = pl.cdiv(num_blocks, nc)           # reduction steps per core
    covered = nc * spc * tm * LANES
    needs_mask = covered > n                # any padded / out-of-range elements?

    kernel = functools.partial(
        _gan_loss_kernel,
        gan_mode=gan_mode,
        target=target,
        scale=sign / n,
        steps_per_core=spc,
        block_rows=tm,
        valid_elems=n,
        needs_mask=needs_mask,
    )

    # Clamp the block index so out-of-range steps re-read a valid block (their
    # contribution is zeroed by the in-kernel mask keyed on the *logical* index).
    def in_map(c, i):
        return (jnp.minimum(c * spc + i, num_blocks - 1), 0)

    partials = pl.pallas_call(
        kernel,
        out_shape=jax.ShapeDtypeStruct((nc, 1, 1), jnp.float32),
        grid_spec=pltpu.PrefetchScalarGridSpec(
            num_scalar_prefetch=0,
            grid=(nc, spc),
            in_specs=[pl.BlockSpec((tm, LANES), in_map)],
            out_specs=pl.BlockSpec((None, 1, 1), lambda c, i: (c, 0, 0)),
            scratch_shapes=[pltpu.VMEM((SUBLANES, LANES), jnp.float32)],
        ),
        compiler_params=pltpu.CompilerParams(
            dimension_semantics=("parallel", "arbitrary")),
        # NOTE: pipeline_mode=pl.Buffered(3) on the input is a further few-% option
        # on v7x if the DMA is still exposed after the 2 MiB tiles; omitted here.
    )(x2d)

    return jnp.sum(partials)


def gan_loss_reference(prediction, target_is_real, gan_mode='lsgan',
                       target_real_label=1.0, target_fake_label=0.0):
    """Pure-JAX reference mirroring the PyTorch module."""
    x = prediction.astype(jnp.float32)
    t = target_real_label if target_is_real else target_fake_label
    if gan_mode == 'lsgan':
        return jnp.mean((x - t) ** 2)
    if gan_mode == 'vanilla':
        return jnp.mean(jnp.maximum(x, 0.0) - x * t
                        + jnp.log1p(jnp.exp(-jnp.abs(x))))
    # wgangp
    return -jnp.mean(x) if target_is_real else jnp.mean(x)


if __name__ == "__main__":
    key = jax.random.PRNGKey(0)
    # Discriminator-style patch output (e.g. PatchGAN logits).
    prediction = jax.random.normal(key, (2, 4, 16, 16), dtype=jnp.float32) * 1.5 + 0.3

    results = []
    for mode in ('lsgan', 'vanilla', 'wgangp'):
        for is_real in (True, False):
            got = gan_loss(prediction, is_real, gan_mode=mode)
            ref = gan_loss_reference(prediction, is_real, gan_mode=mode)
            results.append((mode, is_real, got, ref))
    jax.block_until_ready([r[2] for r in results])

    for mode, is_real, got, ref in results:
        g, r = float(got), float(ref)
        assert abs(g - r) < 1e-5 + 1e-4 * abs(r), (mode, is_real, g, r)
    print("KERNEL_OK")
</pallas_src>

<mosaic_0001>
module attributes {stable_mosaic.version = 11 : i64} {
  func.func @_gan_loss_kernel(%arg0: i32, %arg1: i32, %arg2: memref<16x128xf32, #tpu.memory_space<vmem>>, %arg3: memref<1x1x1xf32, #tpu.memory_space<vmem>>, %arg4: memref<8x128xf32, #tpu.memory_space<vmem>>) attributes {dimension_semantics = [#tpu.dimension_semantics<parallel>, #tpu.dimension_semantics<arbitrary>], iteration_bounds = array<i64: 2, 1>, scalar_prefetch = 0 : i64, scratch_operands = 1 : i64, tpu.core_type = #tpu.core_type<tc>, window_params = [{transform_indices = @transform_0, window_bounds = array<i64: 16, 128>}, {transform_indices = @transform_1, window_bounds = array<i64: 1, 1, 1>}]} {
    %c0_i32 = arith.constant 0 : i32
    %0 = arith.cmpi eq, %arg1, %c0_i32 : i32
    %1 = arith.extui %0 : i1 to i32
    %c0_i32_0 = arith.constant 0 : i32
    %2 = arith.cmpi ne, %1, %c0_i32_0 : i32
    scf.if %2 {
      %cst_8 = arith.constant 0.000000e+00 : f32
      %18 = vector.broadcast %cst_8 : f32 to vector<8x128xf32>
      %c0_9 = arith.constant 0 : index
      %c0_10 = arith.constant 0 : index
      %19 = vector.load %arg4[%c0_9, %c0_10] : memref<8x128xf32, #tpu.memory_space<vmem>>, vector<8x128xf32>
      tpu.vector_store %arg4[%c0_9, %c0_10], %18 {strides = array<i32>} : memref<8x128xf32, #tpu.memory_space<vmem>>, vector<8x128xf32>,
    } else {
    }
    %c0 = arith.constant 0 : index
    %c0_1 = arith.constant 0 : index
    %3 = vector.load %arg2[%c0, %c0_1] : memref<16x128xf32, #tpu.memory_space<vmem>>, vector<16x128xf32>
    %cst = arith.constant 1.000000e+00 : f32
    %4 = vector.broadcast %cst : f32 to vector<16x128xf32>
    %5 = arith.subf %3, %4 : vector<16x128xf32>
    %6 = arith.mulf %5, %5 : vector<16x128xf32>
    %c1_i32 = arith.constant 1 : i32
    %7 = arith.muli %arg0, %c1_i32 : i32
    %8 = arith.addi %7, %arg1 : i32
    %c1_i32_2 = arith.constant 1 : i32
    %9 = arith.cmpi slt, %8, %c1_i32_2 : i32
    %10 = arith.extui %9 : i1 to i32
    %c0_i32_3 = arith.constant 0 : i32
    %11 = arith.cmpi ne, %10, %c0_i32_3 : i32
    scf.if %11 {
      %18 = vector.shape_cast %6 : vector<16x128xf32> to vector<2x8x128xf32>
      %c0_8 = arith.constant 0 : index
      %c0_9 = arith.constant 0 : index
      %19 = vector.load %arg4[%c0_8, %c0_9] : memref<8x128xf32, #tpu.memory_space<vmem>>, vector<8x128xf32>
      %cst_10 = arith.constant dense<0.000000e+00> : vector<8x128xf32>
      %20 = vector.multi_reduction <add>, %18, %cst_10 [0] : vector<2x8x128xf32> to vector<8x128xf32>
      %21 = arith.addf %19, %20 : vector<8x128xf32>
      %c0_11 = arith.constant 0 : index
      %c0_12 = arith.constant 0 : index
      %22 = vector.load %arg4[%c0_11, %c0_12] : memref<8x128xf32, #tpu.memory_space<vmem>>, vector<8x128xf32>
      tpu.vector_store %arg4[%c0_11, %c0_12], %21 {strides = array<i32>} : memref<8x128xf32, #tpu.memory_space<vmem>>, vector<8x128xf32>,
    } else {
    }
    %c1_i32_4 = arith.constant 1 : i32
    %12 = arith.cmpi sge, %8, %c1_i32_4 : i32
    %13 = arith.extui %12 : i1 to i32
    %c0_i32_5 = arith.constant 0 : i32
    %14 = arith.cmpi ne, %13, %c0_i32_5 : i32
    scf.if %14 {
      %18 = tpu.iota {dimensions = array<i32: 0>} : vector<16x128xi32>
      %19 = tpu.iota {dimensions = array<i32: 1>} : vector<16x128xi32>
      %c128_i32 = arith.constant 128 : i32
      %20 = vector.broadcast %c128_i32 : i32 to vector<16x128xi32>
      %21 = arith.muli %18, %20 : vector<16x128xi32>
      %22 = arith.addi %21, %19 : vector<16x128xi32>
      %c2048_i32 = arith.constant 2048 : i32
      %23 = arith.muli %8, %c2048_i32 : i32
      %c2048_i32_8 = arith.constant 2048 : i32
      %24 = arith.subi %c2048_i32_8, %23 : i32
      %25 = vector.broadcast %24 : i32 to vector<16x128xi32>
      %26 = arith.cmpi slt, %22, %25 : vector<16x128xi32>
      %cst_9 = arith.constant 0.000000e+00 : f32
      %27 = vector.broadcast %cst_9 : f32 to vector<16x128xf32>
      %28 = arith.select %26, %6, %27 : vector<16x128xi1>, vector<16x128xf32>
      %29 = vector.shape_cast %28 : vector<16x128xf32> to vector<2x8x128xf32>
      %c0_10 = arith.constant 0 : index
      %c0_11 = arith.constant 0 : index
      %30 = vector.load %arg4[%c0_10, %c0_11] : memref<8x128xf32, #tpu.memory_space<vmem>>, vector<8x128xf32>
      %cst_12 = arith.constant dense<0.000000e+00> : vector<8x128xf32>
      %31 = vector.multi_reduction <add>, %29, %cst_12 [0] : vector<2x8x128xf32> to vector<8x128xf32>
      %32 = arith.addf %30, %31 : vector<8x128xf32>
      %c0_13 = arith.constant 0 : index
      %c0_14 = arith.constant 0 : index
      %33 = vector.load %arg4[%c0_13, %c0_14] : memref<8x128xf32, #tpu.memory_space<vmem>>, vector<8x128xf32>
      tpu.vector_store %arg4[%c0_13, %c0_14], %32 {strides = array<i32>} : memref<8x128xf32, #tpu.memory_space<vmem>>, vector<8x128xf32>,
    } else {
    }
    %c0_i32_6 = arith.constant 0 : i32
    %15 = arith.cmpi eq, %arg1, %c0_i32_6 : i32
    %16 = arith.extui %15 : i1 to i32
    %c0_i32_7 = arith.constant 0 : i32
    %17 = arith.cmpi ne, %16, %c0_i32_7 : i32
    scf.if %17 {
      %c0_8 = arith.constant 0 : index
      %c0_9 = arith.constant 0 : index
      %18 = vector.load %arg4[%c0_8, %c0_9] : memref<8x128xf32, #tpu.memory_space<vmem>>, vector<8x128xf32>
      %cst_10 = arith.constant dense<0.000000e+00> : vector<128xf32>
      %19 = vector.multi_reduction <add>, %18, %cst_10 [0] : vector<8x128xf32> to vector<128xf32>
      %20 = vector.shape_cast %19 : vector<128xf32> to vector<1x128xf32>
      %cst_11 = arith.constant dense<0.000000e+00> : vector<1xf32>
      %21 = vector.multi_reduction <add>, %20, %cst_11 [1] : vector<1x128xf32> to vector<1xf32>
      %22 = vector.shape_cast %21 : vector<1xf32> to vector<1x1xf32>
      %cst_12 = arith.constant 4.8828125E-4 : f32
      %23 = vector.broadcast %cst_12 : f32 to vector<1x1xf32>
      %24 = arith.mulf %22, %23 : vector<1x1xf32>
      %c0_13 = arith.constant 0 : index
      %c0_14 = arith.constant 0 : index
      %c0_15 = arith.constant 0 : index
      %25 = vector.load %arg3[%c0_13, %c0_14, %c0_15] : memref<1x1x1xf32, #tpu.memory_space<vmem>>, vector<1x1x1xf32>
      %26 = vector.shape_cast %25 : vector<1x1x1xf32> to vector<1x1xf32>
      %27 = vector.shape_cast %24 : vector<1x1xf32> to vector<1x1x1xf32>
      tpu.vector_store %arg3[%c0_13, %c0_14, %c0_15], %27 {strides = array<i32>} : memref<1x1x1xf32, #tpu.memory_space<vmem>>, vector<1x1x1xf32>,
    } else {
    }
    return
  }
  func.func @transform_0(%arg0: i32, %arg1: i32) -> (i32, i32) {
    %c1_i32 = arith.constant 1 : i32
    %0 = arith.muli %arg0, %c1_i32 : i32
    %1 = arith.addi %0, %arg1 : i32
    %c0_i32 = arith.constant 0 : i32
    %2 = arith.minsi %1, %c0_i32 : i32
    %c0_i32_0 = arith.constant 0 : i32
    %c0_i32_1 = arith.constant 0 : i32
    return %2, %c0_i32_0 : i32, i32
  }
  func.func @transform_1(%arg0: i32, %arg1: i32) -> (i32, i32, i32) {
    %c0_i32 = arith.constant 0 : i32
    %c0_i32_0 = arith.constant 0 : i32
    %c0_i32_1 = arith.constant 0 : i32
    return %arg0, %c0_i32, %c0_i32_0 : i32, i32, i32
  }
}

</mosaic_0001>

<bundles_post_ra>
// kernel: tpu_custom_call.1
= control target key start
LH: loop header
LB: loop body
LE: loop exit
PB: predicated region body
PF: predicated region fallthrough
CT: control target
= control target key end

     0   :  { %6 = vsyncpa [#allocation4], 0  ;;  %s547_s0 = inlined_call_operand.hbm [shape: f32[16,128], index: 0, kind: input, shape index: {}]   ;;  %s548_s1 = inlined_call_operand.vmem [shape: f32[2,1,1], index: 1, kind: output, shape index: {}]  }
   0x1   :  { %8 = vsyncpa [#allocation4 + $0x1], 0  ;;  %s454_s6 = smov 0   ;;  %s456_s7 = smov 0  }
   0x2   :  { %s458_s8 = smov 0   ;;  %s460_s9 = smov 0  }
   0x3   :  { %s462_s10 = smov 0  }
   0x4 LB: > { %s286_s11 = sadd.s32 4294967295, %s438_s10   ;;  %s26_s12 = sadd.s32 1, %s434_s9  ;;  %s438_s10 = sphi %s462_s10, %s14_s10   ;;  %s434_s9 = sphi %s460_s9, %s553_s9   ;;  %s430_s8 = sphi %s458_s8, %s552_s8   ;;  %s426_s7 = sphi %s456_s7, %s537_s7   ;;  %s422_s6 = sphi %s454_s6, %s551_s6  }
   0x5   : > { %p28_p0 = scmp.ge.s32.totalorder %s26_s12, 2  ;;  %p419_p1 = scmp.ne.s32.totalorder %s426_s7, 0 }
   0x6   : > { %p47_p2 = scmp.eq.s32.totalorder %s438_s10, 0  ;;  %p52_p3 = scmp.ne.s32.totalorder %s426_s7, %s422_s6 }
   0x7   : > { %s555_s12 = smov (%p28_p0, %s26_s12), 0  ;;  %p53_p4 = scmp.eq.s32.totalorder %s286_s11, 0 }
   0x8   : > { %p48_p5 = por %p419_p1, %p47_p2  ;;  %p309_p7 = scmp.lt.s32.totalorder %s438_s10, 2 }
   0x9   : > { %p484_p6 = por %p53_p4, %p52_p3  ;;  %s115_s16 = sshll.u32 %s547_s0, 4  ;;  %s116_s16 = int_to_ptr.hbm [resolvable:$true] %s115_s16 }
   0xa   : > { %s440_s17 = smov [#allocation3]   ;;  %p492_p8 = pnand %p309_p7, %p48_p5 }
   0xb   : > { %s117_s18 = sshll.u32 %s440_s17, 4  ;;  %p293_p9 = scmp.ge.s32.totalorder %s438_s10, 1  ;;  %s118_s18 = int_to_ptr.vmem [resolvable:$true] %s117_s18 }
   0xc   : > { %p125_p10 = scmp.lt.s32.totalorder %s438_s10, 3  ;;  %s361_s20 = sshra.s32 %s116_s16, 4  ;;  %s362_s20 = int_to_ptr.hbm [resolvable:$true] %s361_s20 }
   0xd   : > { %s363_s21 = scalar_lea.hbm %s362_s20, 16  ;;  %p365_p12 = pneg %p492_p8 }
   0xe   : > { %p364_p11 = scmp.ne.s32.totalorder %s362_s20, %s363_s21  ;;  %s368_s24 = scalar_lea.hbm %s547_s0, 16 }
   0xf   : > { %p370_p1 = scmp.lt.s32.totalorder %s368_s24, %s363_s21 }
  0x10   : > { %p366_p13 = pnand %p365_p12, %p364_p11 }
  0x12   : > { %p367_p0 = pneg %p366_p13 }
  0x14   : > { %p372_p2 = pnand %p370_p1, %p367_p0 }
  0x16   : > { %375 = shalt.err (!%p372_p2)
}
  0x17   : > { %s441_s25 = smov 128   ;;  %s442_s26 = smov 8  }
  0x18   : > { %308 = dma.hbm_to_vmem [thread:$0]  (!%p492_p8), %s116_s16, 256, %s118_s18, [#allocation4], %s441_s25, %s441_s25, %s442_s26  }
  0x19   : > { %p126_p3 = pnand %p293_p9, %p125_p10 }
  0x1a   : > { %s131_s27 = sand.u32 (!%p126_p3), 1, %s426_s7  }
  0x1b   : > { %129 = sbr.rel (%p126_p3) target bundleno = 206 (0xce), region = 24  ;;  %s294_s28 = sshll.u32 (!%p126_p3), %s131_s27, 4 }
  0x1c   : > { %s132_s29 = scalar_lea.sflag (!%p126_p3), [#allocation4], %s131_s27  ;;  %s135_s30 = scalar_lea.vmem (!%p126_p3), [#allocation3], %s294_s28 }
  0x20   : > { %416 = dma.done.wait (%p484_p6), %s132_s29, 256  }
  0x21   : > { %418 = vsyncadd (%p484_p6), %s132_s29, 4294967040  ;;  %p157_p4 = scmp.lt.s32.totalorder %s430_s8, 1  ;;  %v443_v0 = vmov 0.0   ;;  %v165_v1 = vld [vmem:[%s135_s30] sm:$0xff]  ;;  %v166_v2 = vld [vmem:[%s135_s30 + $0x8] sm:$0xff]  ;;  %p297_p5 = scmp.ge.s32.totalorder %s430_s8, 1 }
  0x22   : > { %164 = vst [vmem:[#allocation2] sm:$0xff] %v443_v0  ;;  %v295_v3 = vadd.f32 -1.0, %v165_v1  ;;  %v296_v4 = vadd.f32 -1.0, %v166_v2 }
  0x23   : > { %s518_s2 = scalar_select %p157_p4, %s430_s8, 1 }
  0x24   : > { %v169_v5 = vmul.f32 %v295_v3, %v295_v3  ;;  %v170_v6 = vmul.f32 %v296_v4, %v296_v4  ;;  %175 = sbr.rel (%p297_p5) target bundleno = 46 (0x2e), region = 36 }
  0x25   : > { %s159_s5 = scalar_lea.vmem %s548_s1, %s518_s2 }
  0x29   : > { %v176_v7 = vld [vmem:[#allocation2] sm:$0xff]  ;;  %v177_v8 = vadd.f32 %v170_v6, %v169_v5 }
  0x2b   : > { %v178_v9 = vadd.f32 %v177_v8, %v176_v7 }
  0x2d   : > { %179 = vst [vmem:[#allocation2] sm:$0xff] %v178_v9 }
  0x2e PF: > { %183 = sbr.rel (%p157_p4) target bundleno = 68 (0x44), region = 40  ;;  %s299_s6 = sshll.u32 (!%p157_p4), %s430_s8, 11 }
  0x2f   : > { %s194_s11 = ssub.s32 (!%p157_p4), 2048, %s299_s6 }
  0x33   : > { %v184_v10 = vlaneseq  ;;  %v195_v15 = vstv %s194_s11 }
  0x34   : > { %v200_v21 = vld [vmem:[#allocation2] sm:$0xff] }
  0x35   : > { %v185_v11 = vshrl.u32 %v184_v10, 7  ;;  %v188_v12 = vand.u32 127, %v184_v10 }
  0x37   : > { %v186_v13 = vadd.s32 8, %v185_v11  ;;  %v189_v14 = vmul.u32 128, %v185_v11 }
  0x39   : > { %v190_v16 = vmul.u32 128, %v186_v13  ;;  %v191_v17 = vadd.s32 %v189_v14, %v188_v12 }
  0x3b   : > { %v192_v18 = vadd.s32 %v190_v16, %v188_v12  ;;  %vm196_vm0 = vcmp.lt.s32.totalorder %v191_v17, %v195_v15 }
  0x3c   : > { %v198_v19 = vsel %vm196_vm0, %v169_v5, 0.0 }
  0x3d   : > { %vm197_vm1 = vcmp.lt.s32.totalorder %v192_v18, %v195_v15 }
  0x3e   : > { %v199_v20 = vsel %vm197_vm1, %v170_v6, 0.0 }
  0x3f   : > { %v201_v22 = vadd.f32 %v199_v20, %v198_v19 }
  0x41   : > { %v202_v23 = vadd.f32 %v201_v22, %v200_v21 }
  0x43   : > { %203 = vst [vmem:[#allocation2] sm:$0xff] %v202_v23 }
  0x44 PF: > { %vm217_vm2 = vcmask 0  }
  0x4a   : > { %v207_v24 = vld [vmem:[#allocation2] sm:$0xff] }
  0x4b   : > { %v208_v25 = vrot.slane %v207_v24, 4 }
  0x4d   : > { %v209_v26 = vadd.f32 %v208_v25, %v207_v24 }
  0x4f   : > { %v210_v27 = vrot.slane %v209_v26, 2 }
  0x51   : > { %v211_v28 = vadd.f32 %v210_v27, %v209_v26 }
  0x53   : > { %v212_v29 = vrot.slane %v211_v28, 1 }
  0x55   : > { %v213_v30 = vadd.f32 %v212_v29, %v211_v28 }
  0x57   : > { %214 = vadd.xlane.f32.xlu0 %v213_v30 }
  0xca   : > { %v215_v31 = vpop.xlane.xlu0 %214 }
  0xcb   : > { %v216_v32 = vmul.f32 0.00048828125, %v215_v31 }
  0xcd   : > { %218 = vst.msk [vmem:[%s159_s5] sm:$0x1] %vm217_vm2, %v216_v32 }
  0xce PF: > { %s14_s10 = sadd.s32 1, %s438_s10   ;;  %s551_s6 = smov %s426_s7 }
  0xcf   : > { %p11_p6 = scmp.ge.s32.totalorder %s14_s10, 4   ;;  %s537_s7 = smov 0  }
  0xd0   : > { %s552_s8 = smov %s434_s9  ;;  %s553_s9 = smov %s555_s12 }
  0xd1   :  { %13 = sbr.rel (!%p11_p6) target bundleno = 4 (0x4), region = 80 }
  0xd6   :  { %236 = vsyncpa [#allocation4], 1 }
  0xd7   :  { %238 = vsyncpa [#allocation4 + $0x1], 1 }

</bundles_post_ra>
